<compile_context>
chip_gen: v5e
topology: v5e:2x2
jax: 0.10.0
libtpu: 0.0.40
codegen_flags: <defaults>
</compile_context>

<pallas_src>
import math
import jax
import jax.numpy as jnp
from jax.experimental import pallas as pl
from jax.experimental.pallas import tpu as pltpu


def _embed2dist_kernel(x_ref, w_ref, b_ref, o_ref):
    # MXU matmul with f32 accumulation on native-dtype operands (bf16 callers get
    # the bf16 MXU path for free; accumulation stays f32).
    logits = jnp.dot(x_ref[...], w_ref[...],
                     preferred_element_type=jnp.float32) + b_ref[...]
    # Numerically-stable softmax over the lane-dense (128-padded) class dim,
    # kept in f32 on all chip generations (v5e VPU/EUP have no bf16 path).
    m = jnp.max(logits, axis=-1, keepdims=True)
    e = jnp.exp(logits - m)
    denom = jnp.sum(e, axis=-1, keepdims=True)
    # Exact per-row reciprocal (NOT pl.reciprocal(approx=True)): the approximate
    # EUP reciprocal left rows normalized only to ~1e-3 and broke the
    # sum(out, -1) == 1 check.  One exact f32 divide per row is negligible here
    # (the kernel is HBM-writeback-bound, not VALU-bound).
    inv = 1.0 / denom
    o_ref[...] = (e * inv).astype(o_ref.dtype)


def _round_up(a, b):
    return (a + b - 1) // b * b


def _sublane_rows(dtype):
    """Minimum second-to-last tile dim for a dtype: 8 (f32), 16 (bf16), 32 (int8/fp8)."""
    return max(8, 32 // jnp.dtype(dtype).itemsize)


def _vmem_budget_bytes():
    """Scoped-VMEM budget: ~75% of the attached chip's physical VMEM; assume the
    smallest generation (v7x, 64 MiB/TC) when the query is unavailable
    (e.g. interpret mode / no TPU attached)."""
    phys = 64 * 1024 * 1024
    try:
        phys = int(pltpu.get_tpu_info().vmem_capacity_bytes)
    except Exception:
        pass
    return (phys * 3) // 4


def prepare_embed2dist_params(weight, bias, *, param_dtype=None):
    """One-time parameter prep (call at module init, NOT per forward):
    transpose nn.Linear's (N, D) weight into a lane-dense (D, Np) layout with the
    class dim padded to a multiple of 128, and pad the f32 bias with a large
    *finite* negative so padded classes softmax to exactly 0.  Hoisting this out
    of the forward removes a per-call XLA transpose+pad pass over the weight.
    Pass param_dtype=jnp.bfloat16 (with bf16 activations) to halve the resident-W
    VMEM footprint and take the bf16 MXU path."""
    N, D = weight.shape
    Np = _round_up(N, 128)
    dt = jnp.dtype(param_dtype) if param_dtype is not None else weight.dtype
    w_t = jnp.zeros((D, Np), dtype=dt).at[:, :N].set(weight.T.astype(dt))
    b_pad = jnp.full((1, Np), -1e30, dtype=jnp.float32).at[0, :N].set(
        bias.astype(jnp.float32))
    return w_t, b_pad, N


def embed2dist_forward(x, w_t, b_pad, n_class, *, tile_m=1024):
    """softmax(x @ W + b, axis=-1) with (w_t, b_pad) from prepare_embed2dist_params.
    x: (..., D)."""
    orig_shape = x.shape
    D = orig_shape[-1]
    Dw, Np = w_t.shape
    assert Dw == D, "weight/input dim mismatch"
    x2 = x.reshape(-1, D)
    M = x2.shape[0]

    x_bytes = jnp.dtype(x2.dtype).itemsize
    w_bytes = jnp.dtype(w_t.dtype).itemsize
    sub = _sublane_rows(x2.dtype)

    # --- Explicit VMEM budgeting (scoped limit, not just physical VMEM):
    #   resident : W + bias, counted at 2 buffers to stay safe if the
    #              single-buffer request below is unavailable
    #   per row  : double-buffered x tile + out tile
    budget = _vmem_budget_bytes()
    resident = 2 * (D * Np * w_bytes) + 2 * (Np * 4)
    per_row = 2 * (D * x_bytes + Np * x_bytes)
    avail = budget - resident
    if avail < per_row * sub:
        # TODO(synk): vocab-scale n_class needs an N-tiled online-softmax path
        # (running max/sum scratch + pl.when init/finalize) instead of a resident
        # (D, Np) weight; not needed at this module's class counts.
        raise NotImplementedError(
            "n_class too large for the resident-weight embed2Dist kernel")

    # --- M tiling: as large as the VMEM budget allows (amortizes the ~0.35us/step
    # pipeline overhead), rounded to the dtype's sublane packing.  grid uses cdiv
    # so x is NOT padded (the ragged last block is masked by Pallas; softmax is
    # strictly row-local so garbage pad rows never touch real output).  No forced
    # 2-step split: on single-TC chips (v5e/v6e) it only adds per-step overhead,
    # and on v7x tiny-M work does not amortize the cross-core split anyway.
    tile_eff = min(tile_m, _round_up(M, sub), max(sub, avail // per_row))
    tile_eff = max(sub, (tile_eff // sub) * sub)
    grid_m = pl.cdiv(M, tile_eff)

    cost = pl.CostEstimate(
        flops=2 * M * D * Np,
        transcendentals=M * Np,
        bytes_accessed=M * D * x_bytes + D * Np * w_bytes + Np * 4 + M * Np * x_bytes,
    )

    def run(single_buffer_consts):
        # Grid-invariant W / bias blocks: request a single VMEM buffer (the
        # default double buffer is pure waste for a constant index_map).
        const_kw = (dict(pipeline_mode=pl.Buffered(1))
                    if single_buffer_consts else {})
        return pl.pallas_call(
            _embed2dist_kernel,
            out_shape=jax.ShapeDtypeStruct((M, Np), x2.dtype),
            grid_spec=pl.GridSpec(
                grid=(grid_m,),
                in_specs=[
                    pl.BlockSpec((tile_eff, D), lambda i: (i, 0)),        # x tile (pipelined)
                    pl.BlockSpec((D, Np), lambda i: (0, 0), **const_kw),  # W resident
                    pl.BlockSpec((1, Np), lambda i: (0, 0), **const_kw),  # bias resident
                ],
                out_specs=pl.BlockSpec((tile_eff, Np), lambda i: (i, 0)),
            ),
            compiler_params=pltpu.CompilerParams(
                dimension_semantics=("parallel",),
                vmem_limit_bytes=int(budget)),
            cost_estimate=cost,
        )(x2, w_t, b_pad)

    try:
        out = run(True)
    except Exception:
        # pl.Buffered(1) not supported on this jax version/backend: fall back to
        # the default double-buffered constants (correct, slightly more VMEM).
        out = run(False)

    # Crop the lane padding only when needed (N % 128 != 0); when the class count
    # is already lane-dense the padded buffer is returned as-is and this extra
    # HBM pass over the (dominant-traffic) output is skipped entirely.
    if n_class != Np:
        out = out[:, :n_class]
    return out.reshape(*orig_shape[:-1], n_class)


if __name__ == "__main__":
    # Module config: dim_input=32 (hidden), n_class=10; inputs (batch=2, seq=8, hidden)
    dim_input, n_class = 32, 10
    batch, seq = 2, 8

    key = jax.random.PRNGKey(0)
    kx, kw, kb = jax.random.split(key, 3)

    # Deterministic params mirroring reset_parameters(): U(-stdv, stdv)
    stdv = 1.0 / math.sqrt(dim_input)
    weight = jax.random.uniform(kw, (n_class, dim_input), jnp.float32, -stdv, stdv)
    bias = jax.random.uniform(kb, (n_class,), jnp.float32, -stdv, stdv)
    x = jax.random.normal(kx, (batch, seq, dim_input), jnp.float32)

    # Parameter prep happens once (module init time), not per forward call.
    w_t, b_pad, n_cls = prepare_embed2dist_params(weight, bias)

    out = embed2dist_forward(x, w_t, b_pad, n_cls)
    jax.block_until_ready(out)

    # Reference check.  Elementwise tolerance covers MXU default-precision
    # differences vs the XLA reference matmul; the row sums are now exact up to
    # f32 rounding since the softmax uses an exact divide.
    ref = jax.nn.softmax(x @ weight.T + bias, axis=-1)
    assert out.shape == (batch, seq, n_class)
    assert jnp.allclose(out, ref, atol=2e-3, rtol=2e-3)
    assert jnp.allclose(jnp.sum(out, axis=-1), 1.0, atol=1e-4)

    print("KERNEL_OK")
</pallas_src>

<mosaic_0001>
module attributes {stable_mosaic.version = 11 : i64} {
  func.func @_embed2dist_kernel(%arg0: i32, %arg1: memref<16x32xf32, #tpu.memory_space<vmem>>, %arg2: memref<32x128xf32, #tpu.memory_space<vmem>>, %arg3: memref<1x128xf32, #tpu.memory_space<vmem>>, %arg4: memref<16x128xf32, #tpu.memory_space<vmem>>) attributes {dimension_semantics = [#tpu.dimension_semantics<parallel>], iteration_bounds = array<i64: 1>, scalar_prefetch = 0 : i64, scratch_operands = 0 : i64, tpu.core_type = #tpu.core_type<tc>, window_params = [{transform_indices = @transform_0, window_bounds = array<i64: 16, 32>}, {pipeline_mode = #tpu.pipeline_mode<synchronous>, transform_indices = @transform_1, window_bounds = array<i64: 32, 128>}, {pipeline_mode = #tpu.pipeline_mode<synchronous>, transform_indices = @transform_2, window_bounds = array<i64: 1, 128>}, {transform_indices = @transform_3, window_bounds = array<i64: 16, 128>}]} {
    %c0 = arith.constant 0 : index
    %c0_0 = arith.constant 0 : index
    %0 = vector.load %arg1[%c0, %c0_0] : memref<16x32xf32, #tpu.memory_space<vmem>>, vector<16x32xf32>
    %c0_1 = arith.constant 0 : index
    %c0_2 = arith.constant 0 : index
    %1 = vector.load %arg2[%c0_1, %c0_2] : memref<32x128xf32, #tpu.memory_space<vmem>>, vector<32x128xf32>
    %cst = arith.constant dense<0.000000e+00> : vector<16x128xf32>
    %2 = tpu.matmul %0, %1, %cst {dimension_numbers = #tpu.dot_dimension_numbers<[1], [0], [0], [1], [0, 0, 1, 1], [], []>} : vector<16x32xf32>, vector<32x128xf32>, vector<16x128xf32> -> vector<16x128xf32>
    %c0_3 = arith.constant 0 : index
    %c0_4 = arith.constant 0 : index
    %3 = vector.load %arg3[%c0_3, %c0_4] : memref<1x128xf32, #tpu.memory_space<vmem>>, vector<1x128xf32>
    %4 = vector.broadcast %3 : vector<1x128xf32> to vector<16x128xf32>
    %5 = arith.addf %2, %4 : vector<16x128xf32>
    %cst_5 = arith.constant dense<0xFF800000> : vector<16xf32>
    %6 = vector.multi_reduction <maximumf>, %5, %cst_5 [1] : vector<16x128xf32> to vector<16xf32>
    %7 = vector.shape_cast %6 : vector<16xf32> to vector<16x1xf32>
    %8 = vector.broadcast %7 : vector<16x1xf32> to vector<16x128xf32>
    %9 = arith.subf %5, %8 : vector<16x128xf32>
    %10 = math.exp %9 : vector<16x128xf32>
    %cst_6 = arith.constant dense<0.000000e+00> : vector<16xf32>
    %11 = vector.multi_reduction <add>, %10, %cst_6 [1] : vector<16x128xf32> to vector<16xf32>
    %12 = vector.shape_cast %11 : vector<16xf32> to vector<16x1xf32>
    %cst_7 = arith.constant 1.000000e+00 : f32
    %13 = vector.broadcast %cst_7 : f32 to vector<16x1xf32>
    %14 = arith.divf %13, %12 : vector<16x1xf32>
    %15 = vector.broadcast %14 : vector<16x1xf32> to vector<16x128xf32>
    %16 = arith.mulf %10, %15 : vector<16x128xf32>
    %c0_8 = arith.constant 0 : index
    %c0_9 = arith.constant 0 : index
    %17 = vector.load %arg4[%c0_8, %c0_9] : memref<16x128xf32, #tpu.memory_space<vmem>>, vector<16x128xf32>
    tpu.vector_store %arg4[%c0_8, %c0_9], %16 {strides = array<i32>} : memref<16x128xf32, #tpu.memory_space<vmem>>, vector<16x128xf32>,
    return
  }
  func.func @transform_0(%arg0: i32) -> (i32, i32) {
    %c0_i32 = arith.constant 0 : i32
    %c0_i32_0 = arith.constant 0 : i32
    return %arg0, %c0_i32 : i32, i32
  }
  func.func @transform_1(%arg0: i32) -> (i32, i32) {
    %c0_i32 = arith.constant 0 : i32
    %c0_i32_0 = arith.constant 0 : i32
    %c0_i32_1 = arith.constant 0 : i32
    return %c0_i32, %c0_i32_0 : i32, i32
  }
  func.func @transform_2(%arg0: i32) -> (i32, i32) {
    %c0_i32 = arith.constant 0 : i32
    %c0_i32_0 = arith.constant 0 : i32
    %c0_i32_1 = arith.constant 0 : i32
    return %c0_i32, %c0_i32_0 : i32, i32
  }
  func.func @transform_3(%arg0: i32) -> (i32, i32) {
    %c0_i32 = arith.constant 0 : i32
    %c0_i32_0 = arith.constant 0 : i32
    return %arg0, %c0_i32 : i32, i32
  }
}

module attributes {stable_mosaic.version = 11 : i64} {
  func.func @_embed2dist_kernel(%arg0: i32, %arg1: memref<16x32xf32, #tpu.memory_space<vmem>>, %arg2: memref<32x128xf32, #tpu.memory_space<vmem>>, %arg3: memref<1x128xf32, #tpu.memory_space<vmem>>, %arg4: memref<16x128xf32, #tpu.memory_space<vmem>>) attributes {dimension_semantics = [#tpu.dimension_semantics<parallel>], iteration_bounds = array<i64: 1>, scalar_prefetch = 0 : i64, scratch_operands = 0 : i64, tpu.core_type = #tpu.core_type<tc>, window_params = [{transform_indices = @transform_0, window_bounds = array<i64: 16, 32>}, {pipeline_mode = #tpu.pipeline_mode<synchronous>, transform_indices = @transform_1, window_bounds = array<i64: 32, 128>}, {pipeline_mode = #tpu.pipeline_mode<synchronous>, transform_indices = @transform_2, window_bounds = array<i64: 1, 128>}, {transform_indices = @transform_3, window_bounds = array<i64: 16, 128>}]} {
    %c0 = arith.constant 0 : index
    %c0_0 = arith.constant 0 : index
    %0 = vector.load %arg1[%c0, %c0_0] : memref<16x32xf32, #tpu.memory_space<vmem>>, vector<16x32xf32>
    %c0_1 = arith.constant 0 : index
    %c0_2 = arith.constant 0 : index
    %1 = vector.load %arg2[%c0_1, %c0_2] : memref<32x128xf32, #tpu.memory_space<vmem>>, vector<32x128xf32>
    %cst = arith.constant dense<0.000000e+00> : vector<16x128xf32>
    %2 = tpu.matmul %0, %1, %cst {dimension_numbers = #tpu.dot_dimension_numbers<[1], [0], [0], [1], [0, 0, 1, 1], [], []>} : vector<16x32xf32>, vector<32x128xf32>, vector<16x128xf32> -> vector<16x128xf32>
    %c0_3 = arith.constant 0 : index
    %c0_4 = arith.constant 0 : index
    %3 = vector.load %arg3[%c0_3, %c0_4] : memref<1x128xf32, #tpu.memory_space<vmem>>, vector<1x128xf32>
    %4 = vector.broadcast %3 : vector<1x128xf32> to vector<16x128xf32>
    %5 = arith.addf %2, %4 : vector<16x128xf32>
    %cst_5 = arith.constant dense<0xFF800000> : vector<16xf32>
    %6 = vector.multi_reduction <maximumf>, %5, %cst_5 [1] : vector<16x128xf32> to vector<16xf32>
    %7 = vector.shape_cast %6 : vector<16xf32> to vector<16x1xf32>
    %8 = vector.broadcast %7 : vector<16x1xf32> to vector<16x128xf32>
    %9 = arith.subf %5, %8 : vector<16x128xf32>
    %10 = math.exp %9 : vector<16x128xf32>
    %cst_6 = arith.constant dense<0.000000e+00> : vector<16xf32>
    %11 = vector.multi_reduction <add>, %10, %cst_6 [1] : vector<16x128xf32> to vector<16xf32>
    %12 = vector.shape_cast %11 : vector<16xf32> to vector<16x1xf32>
    %cst_7 = arith.constant 1.000000e+00 : f32
    %13 = vector.broadcast %cst_7 : f32 to vector<16x1xf32>
    %14 = arith.divf %13, %12 : vector<16x1xf32>
    %15 = vector.broadcast %14 : vector<16x1xf32> to vector<16x128xf32>
    %16 = arith.mulf %10, %15 : vector<16x128xf32>
    %c0_8 = arith.constant 0 : index
    %c0_9 = arith.constant 0 : index
    %17 = vector.load %arg4[%c0_8, %c0_9] : memref<16x128xf32, #tpu.memory_space<vmem>>, vector<16x128xf32>
    tpu.vector_store %arg4[%c0_8, %c0_9], %16 {strides = array<i32>} : memref<16x128xf32, #tpu.memory_space<vmem>>, vector<16x128xf32>,
    return
  }
  func.func @transform_0(%arg0: i32) -> (i32, i32) {
    %c0_i32 = arith.constant 0 : i32
    %c0_i32_0 = arith.constant 0 : i32
    return %arg0, %c0_i32 : i32, i32
  }
  func.func @transform_1(%arg0: i32) -> (i32, i32) {
    %c0_i32 = arith.constant 0 : i32
    %c0_i32_0 = arith.constant 0 : i32
    %c0_i32_1 = arith.constant 0 : i32
    return %c0_i32, %c0_i32_0 : i32, i32
  }
  func.func @transform_2(%arg0: i32) -> (i32, i32) {
    %c0_i32 = arith.constant 0 : i32
    %c0_i32_0 = arith.constant 0 : i32
    %c0_i32_1 = arith.constant 0 : i32
    return %c0_i32, %c0_i32_0 : i32, i32
  }
  func.func @transform_3(%arg0: i32) -> (i32, i32) {
    %c0_i32 = arith.constant 0 : i32
    %c0_i32_0 = arith.constant 0 : i32
    return %arg0, %c0_i32 : i32, i32
  }
}

</mosaic_0001>

<bundles_post_ra>
// kernel: tpu_custom_call.1
= control target key start
LH: loop header
LB: loop body
LE: loop exit
PB: predicated region body
PF: predicated region fallthrough
CT: control target
= control target key end

     0   :  { %8 = vsyncpa [#allocation3], 0  ;;  %s299_s0 = inlined_call_operand.hbm [shape: f32[16,32], index: 0, kind: input, shape index: {}]   ;;  %s300_s1 = inlined_call_operand.hbm [shape: f32[32,128], index: 1, kind: input, shape index: {}]   ;;  %s301_s2 = inlined_call_operand.vmem [shape: f32[1,128], index: 2, kind: input, shape index: {}]   ;;  %s302_s3 = inlined_call_operand.hbm [shape: f32[16,128], index: 3, kind: output, shape index: {}]  }
   0x1   :  { %9 = vsyncpa [#allocation6], 0 }
   0x2   :  { %10 = vsyncpa [#allocation4], 0  ;;  %s15_s14 = sshll.u32 %s299_s0, 4  ;;  %s253_s15 = smov [#allocation2]   ;;  %s16_s14 = int_to_ptr.hbm [resolvable:$true] %s15_s14 }
   0x3   :  { %s17_s16 = sshll.u32 %s253_s15, 4  ;;  %s28_s19 = sshll.u32 %s300_s1, 4  ;;  %s18_s16 = int_to_ptr.vmem [resolvable:$true] %s17_s16  ;;  %s29_s19 = int_to_ptr.hbm [resolvable:$true] %s28_s19 }
   0x4   :  { %s254_s20 = smov 128   ;;  %s255_s21 = smov 8  }
   0x5   :  { %23 = dma.hbm_to_vmem [thread:$0]  %s16_s14, 256, %s18_s16, [#allocation3], %s254_s20, %s254_s20, %s255_s21  }
   0x6   :  { %s256_s22 = smov [#allocation5]  }
   0x7   :  { %s30_s23 = sshll.u32 %s256_s22, 4  ;;  %s31_s23 = int_to_ptr.vmem [resolvable:$true] %s30_s23 }
   0x8   :  { %36 = dma.hbm_to_vmem [thread:$0]  %s29_s19, 512, %s31_s23, [#allocation6], %s254_s20, %s254_s20, %s255_s21  }
   0x9   :  { %247 = dma.done.wait [#allocation3], 256  }
   0xa   :  { %248 = vsyncadd [#allocation3], 4294967040 }
   0xb   :  { %249 = dma.done.wait [#allocation6], 512  }
   0xc   :  { %250 = vsyncadd [#allocation6], 4294966784  ;;  %v52_v0 = vld [vmem:[#allocation5 + $0x18] sm:$0xff]  ;;  %v51_v1 = vld [vmem:[#allocation5 + $0x10] sm:$0xff]  ;;  %vm57_vm0 = vcmask 261120   ;;  %s141_s27 = sshll.u32 %s302_s3, 4  ;;  %s142_s27 = int_to_ptr.hbm [resolvable:$true] %s141_s27 }
   0xd   :  { %76 = vmatpush.msra.mxu0 %v52_v0  ;;  %157 = vmatpush.msra.mxu1 %v52_v0  ;;  %v50_v2 = vld [vmem:[#allocation5 + $0x8] sm:$0xff]  ;;  %v49_v3 = vld [vmem:[#allocation5] sm:$0xff]  ;;  %v47_v4 = vld [vmem:[#allocation2] sm:$0xff] }
   0xe   :  { %v48_v5 = vld [vmem:[#allocation2 + $0x8] sm:$0xff]  ;;  %v166_v6 = vld [vmem:[%s301_s2] ss:$0 sm:$0xff]  ;;  %s257_s2 = smov [#allocation7]  }
   0xf   :  { %77 = vmatpush.msra.mxu0 %v51_v1  ;;  %158 = vmatpush.msra.mxu1 %v51_v1  ;;  %s139_s24 = sshll.u32 %s257_s2, 4  ;;  %s140_s24 = int_to_ptr.vmem [resolvable:$true] %s139_s24 }
  0x11   :  { %78 = vmatpush.msra.mxu0 %v50_v2  ;;  %159 = vmatpush.msra.mxu1 %v50_v2 }
  0x13   :  { %79 = vmatpush.msra.mxu0 %v49_v3  ;;  %160 = vmatpush.msra.mxu1 %v49_v3 }
  0x14   :  { %155 = vmatmul.msk.f32.vlgmr.msra.gmra.mxu0 %vm57_vm0, %v47_v4  ;;  %156 = vmatmul.msk.f32.vlgmr.msra.gmra.mxu1 %vm57_vm0, %v48_v5 }
  0x91   :  { %v81_v7 = vpop.f32.mrf.mxu0  ;;  %v84_v9 = vpop.f32.mrf.mxu1 }
  0x92   :  { %v82_v8 = vadd.f32 %v166_v6, %v81_v7  ;;  %v85_v10 = vadd.f32 %v166_v6, %v84_v9 }
  0x94   :  { %87 = vmax.xlane.f32.xlu0 %v82_v8 }
  0x9c   :  { %89 = vmax.xlane.f32.xlu0 %v85_v10 }
 0x107   :  { %v88_v11 = vpop.xlane.xlu0 %87 }
 0x108   :  { %v91_v12 = vsub.f32 %v82_v8, %v88_v11 }
 0x10a   :  { %v93_v13 = vmul.f32 1.442695, %v91_v12 }
 0x10c   :  { %167 = vpow2.f32 %v93_v13 }
 0x10f   :  { %v90_v14 = vpop.xlane.xlu0 %89 }
 0x110   :  { %v92_v15 = vsub.f32 %v85_v10, %v90_v14 }
 0x112   :  { %v168_v16 = vpop.eup %167  ;;  %v95_v17 = vmul.f32 1.442695, %v92_v15 }
 0x113   :  { %97 = vadd.xlane.f32.xlu1 %v168_v16 }
 0x114   :  { %169 = vpow2.f32 %v95_v17 }
 0x11a   :  { %v170_v18 = vpop.eup %169 }
 0x11b   :  { %99 = vadd.xlane.f32.xlu1 %v170_v18 }
 0x186   :  { %v98_v19 = vpop.xlane.xlu1 %97 }
 0x187   :  { %171 = vrcp.f32 %v98_v19  ;;  %v112_v24 = vand.u32 2147483648, %v98_v19  ;;  %v110_v26 = vand.u32 2147483647, %v98_v19  ;;  %vm106_vm2 = vweird.f32 %v98_v19 }
 0x189   :  { %v113_v29 = vor.u32 1.1754944e-38, %v112_v24  ;;  %vm111_vm4 = vcmp.eq.f32.partialorder %v110_v26, 8.507059e+37 }
 0x18d   :  { %v172_v20 = vpop.eup %171 }
 0x18e   :  { %v102_v21 = vmul.f32 %v172_v20, %v98_v19  ;;  %v100_v22 = vpop.xlane.xlu1 %99  ;;  %vm107_vm1 = vweird.f32 %v172_v20 }
 0x18f   :  { %173 = vrcp.f32 %v100_v22  ;;  %vm108_vm3 = vmor %vm106_vm2, %vm107_vm1  ;;  %v127_v35 = vand.u32 2147483648, %v100_v22  ;;  %v125_v37 = vand.u32 2147483647, %v100_v22  ;;  %vm121_vm6 = vweird.f32 %v100_v22 }
 0x190   :  { %v103_v23 = vsub.f32 1.0, %v102_v21 }
 0x191   :  { %v128_v39 = vor.u32 1.1754944e-38, %v127_v35  ;;  %vm126_vm8 = vcmp.eq.f32.partialorder %v125_v37, 8.507059e+37 }
 0x192   :  { %v104_v25 = vmul.f32 %v172_v20, %v103_v23 }
 0x194   :  { %v105_v27 = vadd.f32 %v172_v20, %v104_v25 }
 0x195   :  { %v174_v28 = vpop.eup %173 }
 0x196   :  { %v117_v30 = vmul.f32 %v174_v28, %v100_v22  ;;  %v109_v31 = vsel %vm108_vm3, %v172_v20, %v105_v27  ;;  %vm122_vm5 = vweird.f32 %v174_v28 }
 0x197   :  { %v114_v32 = vsel %vm111_vm4, %v113_v29, %v109_v31  ;;  %vm123_vm7 = vmor %vm121_vm6, %vm122_vm5 }
 0x198   :  { %v118_v33 = vsub.f32 1.0, %v117_v30  ;;  %v131_v34 = vmul.f32 %v168_v16, %v114_v32 }
 0x19a   :  { %v119_v36 = vmul.f32 %v174_v28, %v118_v33  ;;  %133 = vst [vmem:[#allocation7] sm:$0xff] %v131_v34 }
 0x19c   :  { %v120_v38 = vadd.f32 %v174_v28, %v119_v36 }
 0x19e   :  { %v124_v40 = vsel %vm123_vm7, %v174_v28, %v120_v38 }
 0x19f   :  { %v129_v41 = vsel %vm126_vm8, %v128_v39, %v124_v40 }
 0x1a0   :  { %v132_v42 = vmul.f32 %v170_v18, %v129_v41 }
 0x1a2   :  { %134 = vst [vmem:[#allocation7 + $0x8] sm:$0xff] %v132_v42 }
 0x1a3   :  { %147 = dma.vmem_to_hbm [thread:$0]  %s140_s24, 256, %s142_s27, [#allocation4], %s254_s20, %s254_s20, %s255_s21  }
 0x1a4   :  { %251 = dma.done.wait [#allocation4], 256  }
 0x1a5   :  { %252 = vsyncadd [#allocation4], 4294967040 }
 0x1a6   :  { %152 = vsyncpa [#allocation3], 1 }
 0x1a7   :  { %153 = vsyncpa [#allocation6], 1 }
 0x1a8   :  { %154 = vsyncpa [#allocation4], 1 }

// kernel: tpu_custom_call.1
= control target key start
LH: loop header
LB: loop body
LE: loop exit
PB: predicated region body
PF: predicated region fallthrough
CT: control target
= control target key end

     0   :  { %8 = vsyncpa [#allocation3], 0  ;;  %s299_s0 = inlined_call_operand.hbm [shape: f32[16,32], index: 0, kind: input, shape index: {}]   ;;  %s300_s1 = inlined_call_operand.hbm [shape: f32[32,128], index: 1, kind: input, shape index: {}]   ;;  %s301_s2 = inlined_call_operand.vmem [shape: f32[1,128], index: 2, kind: input, shape index: {}]   ;;  %s302_s3 = inlined_call_operand.hbm [shape: f32[16,128], index: 3, kind: output, shape index: {}]  }
   0x1   :  { %9 = vsyncpa [#allocation6], 0 }
   0x2   :  { %10 = vsyncpa [#allocation4], 0  ;;  %s15_s14 = sshll.u32 %s299_s0, 4  ;;  %s253_s15 = smov [#allocation2]   ;;  %s16_s14 = int_to_ptr.hbm [resolvable:$true] %s15_s14 }
   0x3   :  { %s17_s16 = sshll.u32 %s253_s15, 4  ;;  %s28_s19 = sshll.u32 %s300_s1, 4  ;;  %s18_s16 = int_to_ptr.vmem [resolvable:$true] %s17_s16  ;;  %s29_s19 = int_to_ptr.hbm [resolvable:$true] %s28_s19 }
   0x4   :  { %s254_s20 = smov 128   ;;  %s255_s21 = smov 8  }
   0x5   :  { %23 = dma.hbm_to_vmem [thread:$0]  %s16_s14, 256, %s18_s16, [#allocation3], %s254_s20, %s254_s20, %s255_s21  }
   0x6   :  { %s256_s22 = smov [#allocation5]  }
   0x7   :  { %s30_s23 = sshll.u32 %s256_s22, 4  ;;  %s31_s23 = int_to_ptr.vmem [resolvable:$true] %s30_s23 }
   0x8   :  { %36 = dma.hbm_to_vmem [thread:$0]  %s29_s19, 512, %s31_s23, [#allocation6], %s254_s20, %s254_s20, %s255_s21  }
   0x9   :  { %247 = dma.done.wait [#allocation3], 256  }
   0xa   :  { %248 = vsyncadd [#allocation3], 4294967040 }
   0xb   :  { %249 = dma.done.wait [#allocation6], 512  }
   0xc   :  { %250 = vsyncadd [#allocation6], 4294966784  ;;  %v52_v0 = vld [vmem:[#allocation5 + $0x18] sm:$0xff]  ;;  %v51_v1 = vld [vmem:[#allocation5 + $0x10] sm:$0xff]  ;;  %vm57_vm0 = vcmask 261120   ;;  %s141_s27 = sshll.u32 %s302_s3, 4  ;;  %s142_s27 = int_to_ptr.hbm [resolvable:$true] %s141_s27 }
   0xd   :  { %76 = vmatpush.msra.mxu0 %v52_v0  ;;  %157 = vmatpush.msra.mxu1 %v52_v0  ;;  %v50_v2 = vld [vmem:[#allocation5 + $0x8] sm:$0xff]  ;;  %v49_v3 = vld [vmem:[#allocation5] sm:$0xff]  ;;  %v47_v4 = vld [vmem:[#allocation2] sm:$0xff] }
   0xe   :  { %v48_v5 = vld [vmem:[#allocation2 + $0x8] sm:$0xff]  ;;  %v166_v6 = vld [vmem:[%s301_s2] ss:$0 sm:$0xff]  ;;  %s257_s2 = smov [#allocation7]  }
   0xf   :  { %77 = vmatpush.msra.mxu0 %v51_v1  ;;  %158 = vmatpush.msra.mxu1 %v51_v1  ;;  %s139_s24 = sshll.u32 %s257_s2, 4  ;;  %s140_s24 = int_to_ptr.vmem [resolvable:$true] %s139_s24 }
  0x11   :  { %78 = vmatpush.msra.mxu0 %v50_v2  ;;  %159 = vmatpush.msra.mxu1 %v50_v2 }
  0x13   :  { %79 = vmatpush.msra.mxu0 %v49_v3  ;;  %160 = vmatpush.msra.mxu1 %v49_v3 }
  0x14   :  { %155 = vmatmul.msk.f32.vlgmr.msra.gmra.mxu0 %vm57_vm0, %v47_v4  ;;  %156 = vmatmul.msk.f32.vlgmr.msra.gmra.mxu1 %vm57_vm0, %v48_v5 }
  0x91   :  { %v81_v7 = vpop.f32.mrf.mxu0  ;;  %v84_v9 = vpop.f32.mrf.mxu1 }
  0x92   :  { %v82_v8 = vadd.f32 %v166_v6, %v81_v7  ;;  %v85_v10 = vadd.f32 %v166_v6, %v84_v9 }
  0x94   :  { %87 = vmax.xlane.f32.xlu0 %v82_v8 }
  0x9c   :  { %89 = vmax.xlane.f32.xlu0 %v85_v10 }
 0x107   :  { %v88_v11 = vpop.xlane.xlu0 %87 }
 0x108   :  { %v91_v12 = vsub.f32 %v82_v8, %v88_v11 }
 0x10a   :  { %v93_v13 = vmul.f32 1.442695, %v91_v12 }
 0x10c   :  { %167 = vpow2.f32 %v93_v13 }
 0x10f   :  { %v90_v14 = vpop.xlane.xlu0 %89 }
 0x110   :  { %v92_v15 = vsub.f32 %v85_v10, %v90_v14 }
 0x112   :  { %v168_v16 = vpop.eup %167  ;;  %v95_v17 = vmul.f32 1.442695, %v92_v15 }
 0x113   :  { %97 = vadd.xlane.f32.xlu1 %v168_v16 }
 0x114   :  { %169 = vpow2.f32 %v95_v17 }
 0x11a   :  { %v170_v18 = vpop.eup %169 }
 0x11b   :  { %99 = vadd.xlane.f32.xlu1 %v170_v18 }
 0x186   :  { %v98_v19 = vpop.xlane.xlu1 %97 }
 0x187   :  { %171 = vrcp.f32 %v98_v19  ;;  %v112_v24 = vand.u32 2147483648, %v98_v19  ;;  %v110_v26 = vand.u32 2147483647, %v98_v19  ;;  %vm106_vm2 = vweird.f32 %v98_v19 }
 0x189   :  { %v113_v29 = vor.u32 1.1754944e-38, %v112_v24  ;;  %vm111_vm4 = vcmp.eq.f32.partialorder %v110_v26, 8.507059e+37 }
 0x18d   :  { %v172_v20 = vpop.eup %171 }
 0x18e   :  { %v102_v21 = vmul.f32 %v172_v20, %v98_v19  ;;  %v100_v22 = vpop.xlane.xlu1 %99  ;;  %vm107_vm1 = vweird.f32 %v172_v20 }
 0x18f   :  { %173 = vrcp.f32 %v100_v22  ;;  %vm108_vm3 = vmor %vm106_vm2, %vm107_vm1  ;;  %v127_v35 = vand.u32 2147483648, %v100_v22  ;;  %v125_v37 = vand.u32 2147483647, %v100_v22  ;;  %vm121_vm6 = vweird.f32 %v100_v22 }
 0x190   :  { %v103_v23 = vsub.f32 1.0, %v102_v21 }
 0x191   :  { %v128_v39 = vor.u32 1.1754944e-38, %v127_v35  ;;  %vm126_vm8 = vcmp.eq.f32.partialorder %v125_v37, 8.507059e+37 }
 0x192   :  { %v104_v25 = vmul.f32 %v172_v20, %v103_v23 }
 0x194   :  { %v105_v27 = vadd.f32 %v172_v20, %v104_v25 }
 0x195   :  { %v174_v28 = vpop.eup %173 }
 0x196   :  { %v117_v30 = vmul.f32 %v174_v28, %v100_v22  ;;  %v109_v31 = vsel %vm108_vm3, %v172_v20, %v105_v27  ;;  %vm122_vm5 = vweird.f32 %v174_v28 }
 0x197   :  { %v114_v32 = vsel %vm111_vm4, %v113_v29, %v109_v31  ;;  %vm123_vm7 = vmor %vm121_vm6, %vm122_vm5 }
 0x198   :  { %v118_v33 = vsub.f32 1.0, %v117_v30  ;;  %v131_v34 = vmul.f32 %v168_v16, %v114_v32 }
 0x19a   :  { %v119_v36 = vmul.f32 %v174_v28, %v118_v33  ;;  %133 = vst [vmem:[#allocation7] sm:$0xff] %v131_v34 }
 0x19c   :  { %v120_v38 = vadd.f32 %v174_v28, %v119_v36 }
 0x19e   :  { %v124_v40 = vsel %vm123_vm7, %v174_v28, %v120_v38 }
 0x19f   :  { %v129_v41 = vsel %vm126_vm8, %v128_v39, %v124_v40 }
 0x1a0   :  { %v132_v42 = vmul.f32 %v170_v18, %v129_v41 }
 0x1a2   :  { %134 = vst [vmem:[#allocation7 + $0x8] sm:$0xff] %v132_v42 }
 0x1a3   :  { %147 = dma.vmem_to_hbm [thread:$0]  %s140_s24, 256, %s142_s27, [#allocation4], %s254_s20, %s254_s20, %s255_s21  }
 0x1a4   :  { %251 = dma.done.wait [#allocation4], 256  }
 0x1a5   :  { %252 = vsyncadd [#allocation4], 4294967040 }
 0x1a6   :  { %152 = vsyncpa [#allocation3], 1 }
 0x1a7   :  { %153 = vsyncpa [#allocation6], 1 }
 0x1a8   :  { %154 = vsyncpa [#allocation4], 1 }

</bundles_post_ra>
